<compile_context>
chip_gen: v5e
topology: v5e:2x2
jax: 0.10.0
libtpu: 0.0.40
codegen_flags: <defaults>
</compile_context>

<pallas_src>
import functools

import jax
import jax.numpy as jnp
from jax.experimental import pallas as pl
from jax.experimental.pallas import tpu as pltpu


def _sgu_kernel(x_ref, w1t_ref, b1_ref, w2t_ref, b2_ref, o_ref, *, h_half):
    # x_ref  : [TM, H]    activation row tile (u | v concatenated on lanes)
    # w1t_ref: [H/2, H/2] pre-transposed (in, out)
    # b1_ref : [1, H/2]   f32
    # w2t_ref: [H/2, H]   pre-transposed (in, out)
    # b2_ref : [1, H]     f32
    # o_ref  : [TM, H]
    u = x_ref[:, :h_half]          # static slices of the VMEM tile; zero-cost
    v = x_ref[:, h_half:]          # views whenever h_half % 128 == 0

    # v = proj(v): v @ W1t + b1   (f32 accumulation on the MXU)
    v_proj = jnp.dot(v, w1t_ref[...], preferred_element_type=jnp.float32)
    v_proj = v_proj + b1_ref[...]

    # gating multiply in f32 (v5e VPU has no bf16 path)
    gated = u.astype(jnp.float32) * v_proj

    # out = proj_v(gated): gated @ W2t + b2
    out = jnp.dot(gated.astype(w2t_ref.dtype), w2t_ref[...],
                  preferred_element_type=jnp.float32)
    out = out + b2_ref[...]

    o_ref[...] = out.astype(o_ref.dtype)


def _round_up(x, m):
    return ((x + m - 1) // m) * m


def _cdiv(a, b):
    return (a + b - 1) // b


def _vmem_capacity_bytes():
    """Physical VMEM of the attached TPU; conservative 64 MiB (v7x) fallback."""
    try:
        info = pltpu.get_tpu_info()
        cap = getattr(info, "vmem_capacity_bytes", None)
        if cap:
            return int(cap)
    except Exception:
        pass
    return 64 * 1024 * 1024


def _plan_tiling(M, H, act_itemsize, w_itemsize):
    """Pick row tile TM and an explicit scoped-VMEM limit.

    Budget = 2x-buffered resident weights + 2x-buffered x/out row tiles
             + ~2H f32 per row of compiler scratch (v_proj / gated / out).
    """
    h_half = H // 2
    cap = _vmem_capacity_bytes()
    budget = min(int(0.75 * cap), 96 * 1024 * 1024)

    weight_bytes = (h_half * h_half + h_half * H) * w_itemsize + (h_half + H) * 4
    avail = budget - 2 * weight_bytes

    per_row = 2 * (H + H) * act_itemsize + 2 * H * 4 + 64

    if avail <= per_row * 8:
        # TODO(synk): at very large H the weights alone nearly fill VMEM --
        # add an output-column grid axis over w2t (and force bf16 weights)
        # instead of shrinking TM to the floor.
        tm = 8
    else:
        tm = min(512, avail // per_row)          # ~512 rows hits HBM roofline
        tm = max(8, (tm // 8) * 8)               # sublane aligned

    # Keep at least 2 grid steps so ("parallel",) feeds both TCs on v7x.
    if M >= 16:
        tm = min(tm, _round_up(_cdiv(M, 2), 8))
    tm = max(8, min(tm, _round_up(M, 8)))

    footprint = (2 * weight_bytes
                 + 2 * tm * 2 * H * act_itemsize
                 + tm * 2 * H * 4)
    vmem_limit = int(min(budget, max(int(footprint * 1.25), 16 * 1024 * 1024)))
    return tm, vmem_limit


def prepare_sgu_params(w1, b1, w2, b2, compute_dtype=None):
    """One-time parameter prep (hoist out of the per-call path):
    transpose PyTorch (out, in) Linear weights to (in, out), reshape biases to
    2D f32, optionally cast weights to a bf16 compute dtype."""
    w1t = jnp.asarray(w1).T                       # (H/2, H/2)
    w2t = jnp.asarray(w2).T                       # (H/2, H)
    if compute_dtype is not None:
        w1t = w1t.astype(compute_dtype)
        w2t = w2t.astype(compute_dtype)
    b1_2d = jnp.asarray(b1).reshape(1, -1).astype(jnp.float32)
    b2_2d = jnp.asarray(b2).reshape(1, -1).astype(jnp.float32)
    return w1t, b1_2d, w2t, b2_2d


def spatial_gating_unit_prepared(x, w1t, b1_2d, w2t, b2_2d):
    """x: (batch, seq, hidden) already in the compute dtype; params prepared."""
    B, S, H = x.shape
    h_half = H // 2
    M = B * S
    x2d = x.reshape(M, H)                          # row-major reshape: no copy

    act_itemsize = jnp.dtype(x.dtype).itemsize
    w_itemsize = jnp.dtype(w1t.dtype).itemsize
    TM, vmem_limit = _plan_tiling(M, H, act_itemsize, w_itemsize)

    grid = (_cdiv(M, TM),)   # ragged last block: OOB output rows are masked,
                             # rows are independent, so no explicit padding.

    out2d = pl.pallas_call(
        functools.partial(_sgu_kernel, h_half=h_half),
        out_shape=jax.ShapeDtypeStruct((M, H), x.dtype),
        grid_spec=pltpu.PrefetchScalarGridSpec(
            num_scalar_prefetch=0,
            grid=grid,
            in_specs=[
                pl.BlockSpec((TM, H), lambda i: (i, 0)),           # x row tile
                pl.BlockSpec((h_half, h_half), lambda i: (0, 0)),  # resident W1t
                pl.BlockSpec((1, h_half), lambda i: (0, 0)),       # resident b1
                pl.BlockSpec((h_half, H), lambda i: (0, 0)),       # resident W2t
                pl.BlockSpec((1, H), lambda i: (0, 0)),            # resident b2
            ],
            out_specs=pl.BlockSpec((TM, H), lambda i: (i, 0)),
        ),
        compiler_params=pltpu.CompilerParams(
            dimension_semantics=("parallel",),     # independent row tiles
            vmem_limit_bytes=vmem_limit),
    )(x2d, w1t, b1_2d, w2t, b2_2d)

    return out2d.reshape(B, S, H)


def spatial_gating_unit(x, w1, b1, w2, b2, compute_dtype=None):
    """Convenience wrapper matching the PyTorch forward.  For repeated calls,
    call prepare_sgu_params() once and reuse spatial_gating_unit_prepared."""
    params = prepare_sgu_params(w1, b1, w2, b2, compute_dtype)
    out_dtype = x.dtype
    if compute_dtype is not None:
        x = x.astype(compute_dtype)
    out = spatial_gating_unit_prepared(x, *params)
    return out.astype(out_dtype)


def reference(x, w1, b1, w2, b2):
    H = x.shape[-1]
    u, v = x[..., : H // 2], x[..., H // 2:]
    v = v @ w1.T + b1
    return (u * v) @ w2.T + b2


if __name__ == "__main__":
    key = jax.random.PRNGKey(0)
    # hidden=256 keeps the halves lane-dense (h_half=128) while staying small.
    batch, seq, hidden_units, num_series = 2, 8, 256, 4  # num_series unused by forward
    h_half = hidden_units // 2

    k_x, k_w1, k_b1, k_w2, k_b2 = jax.random.split(key, 5)
    x = jax.random.normal(k_x, (batch, seq, hidden_units), dtype=jnp.float32)

    # PyTorch Linear layout: weight (out, in), bias (out,)
    w1 = jax.random.normal(k_w1, (h_half, h_half), dtype=jnp.float32) * 0.1
    b1 = jax.random.normal(k_b1, (h_half,), dtype=jnp.float32) * 0.1
    w2 = jax.random.normal(k_w2, (hidden_units, h_half), dtype=jnp.float32) * 0.1
    b2 = jax.random.normal(k_b2, (hidden_units,), dtype=jnp.float32) * 0.1

    ref = reference(x, w1, b1, w2, b2)

    # f32 path: matches the PyTorch forward bit-for-intent.
    out = jax.block_until_ready(spatial_gating_unit(x, w1, b1, w2, b2))
    assert out.shape == (batch, seq, hidden_units)
    assert jnp.allclose(out, ref, atol=1e-4, rtol=1e-4), "f32 mismatch vs reference"

    # bf16 compute path (halved HBM/VMEM traffic, f32 MXU accumulation kept).
    out_bf16 = jax.block_until_ready(
        spatial_gating_unit(x, w1, b1, w2, b2, compute_dtype=jnp.bfloat16))
    assert out_bf16.shape == (batch, seq, hidden_units)
    assert jnp.allclose(out_bf16, ref, atol=1e-1, rtol=1e-1), "bf16 mismatch vs reference"

    print("KERNEL_OK")
</pallas_src>

<mosaic_0001>
module attributes {stable_mosaic.version = 11 : i64} {
  func.func @_sgu_kernel(%arg0: i32, %arg1: memref<8x256xf32, #tpu.memory_space<vmem>>, %arg2: memref<128x128xf32, #tpu.memory_space<vmem>>, %arg3: memref<1x128xf32, #tpu.memory_space<vmem>>, %arg4: memref<128x256xf32, #tpu.memory_space<vmem>>, %arg5: memref<1x256xf32, #tpu.memory_space<vmem>>, %arg6: memref<8x256xf32, #tpu.memory_space<vmem>>) attributes {dimension_semantics = [#tpu.dimension_semantics<parallel>], iteration_bounds = array<i64: 2>, scalar_prefetch = 0 : i64, scratch_operands = 0 : i64, tpu.core_type = #tpu.core_type<tc>, window_params = [{transform_indices = @transform_0, window_bounds = array<i64: 8, 256>}, {pipeline_mode = #tpu.pipeline_mode<synchronous>, transform_indices = @transform_1, window_bounds = array<i64: 128, 128>}, {pipeline_mode = #tpu.pipeline_mode<synchronous>, transform_indices = @transform_2, window_bounds = array<i64: 1, 128>}, {pipeline_mode = #tpu.pipeline_mode<synchronous>, transform_indices = @transform_3, window_bounds = array<i64: 128, 256>}, {pipeline_mode = #tpu.pipeline_mode<synchronous>, transform_indices = @transform_4, window_bounds = array<i64: 1, 256>}, {transform_indices = @transform_5, window_bounds = array<i64: 8, 256>}]} {
    %c0 = arith.constant 0 : index
    %c0_0 = arith.constant 0 : index
    %0 = vector.load %arg1[%c0, %c0_0] : memref<8x256xf32, #tpu.memory_space<vmem>>, vector<8x128xf32>
    %c0_1 = arith.constant 0 : index
    %c128 = arith.constant 128 : index
    %1 = vector.load %arg1[%c0_1, %c128] : memref<8x256xf32, #tpu.memory_space<vmem>>, vector<8x128xf32>
    %c0_2 = arith.constant 0 : index
    %c0_3 = arith.constant 0 : index
    %2 = vector.load %arg2[%c0_2, %c0_3] : memref<128x128xf32, #tpu.memory_space<vmem>>, vector<128x128xf32>
    %cst = arith.constant dense<0.000000e+00> : vector<8x128xf32>
    %3 = tpu.matmul %1, %2, %cst {dimension_numbers = #tpu.dot_dimension_numbers<[1], [0], [0], [1], [0, 0, 1, 1], [], []>} : vector<8x128xf32>, vector<128x128xf32>, vector<8x128xf32> -> vector<8x128xf32>
    %c0_4 = arith.constant 0 : index
    %c0_5 = arith.constant 0 : index
    %4 = vector.load %arg3[%c0_4, %c0_5] : memref<1x128xf32, #tpu.memory_space<vmem>>, vector<1x128xf32>
    %5 = vector.broadcast %4 : vector<1x128xf32> to vector<8x128xf32>
    %6 = arith.addf %3, %5 : vector<8x128xf32>
    %7 = arith.mulf %0, %6 : vector<8x128xf32>
    %c0_6 = arith.constant 0 : index
    %c0_7 = arith.constant 0 : index
    %8 = vector.load %arg4[%c0_6, %c0_7] : memref<128x256xf32, #tpu.memory_space<vmem>>, vector<128x256xf32>
    %cst_8 = arith.constant dense<0.000000e+00> : vector<8x256xf32>
    %9 = tpu.matmul %7, %8, %cst_8 {dimension_numbers = #tpu.dot_dimension_numbers<[1], [0], [0], [1], [0, 0, 1, 1], [], []>} : vector<8x128xf32>, vector<128x256xf32>, vector<8x256xf32> -> vector<8x256xf32>
    %c0_9 = arith.constant 0 : index
    %c0_10 = arith.constant 0 : index
    %10 = vector.load %arg5[%c0_9, %c0_10] : memref<1x256xf32, #tpu.memory_space<vmem>>, vector<1x256xf32>
    %11 = vector.broadcast %10 : vector<1x256xf32> to vector<8x256xf32>
    %12 = arith.addf %9, %11 : vector<8x256xf32>
    %c0_11 = arith.constant 0 : index
    %c0_12 = arith.constant 0 : index
    %13 = vector.load %arg6[%c0_11, %c0_12] : memref<8x256xf32, #tpu.memory_space<vmem>>, vector<8x256xf32>
    tpu.vector_store %arg6[%c0_11, %c0_12], %12 {strides = array<i32>} : memref<8x256xf32, #tpu.memory_space<vmem>>, vector<8x256xf32>,
    return
  }
  func.func @transform_0(%arg0: i32) -> (i32, i32) {
    %c0_i32 = arith.constant 0 : i32
    %c0_i32_0 = arith.constant 0 : i32
    return %arg0, %c0_i32 : i32, i32
  }
  func.func @transform_1(%arg0: i32) -> (i32, i32) {
    %c0_i32 = arith.constant 0 : i32
    %c0_i32_0 = arith.constant 0 : i32
    %c0_i32_1 = arith.constant 0 : i32
    return %c0_i32, %c0_i32_0 : i32, i32
  }
  func.func @transform_2(%arg0: i32) -> (i32, i32) {
    %c0_i32 = arith.constant 0 : i32
    %c0_i32_0 = arith.constant 0 : i32
    %c0_i32_1 = arith.constant 0 : i32
    return %c0_i32, %c0_i32_0 : i32, i32
  }
  func.func @transform_3(%arg0: i32) -> (i32, i32) {
    %c0_i32 = arith.constant 0 : i32
    %c0_i32_0 = arith.constant 0 : i32
    %c0_i32_1 = arith.constant 0 : i32
    return %c0_i32, %c0_i32_0 : i32, i32
  }
  func.func @transform_4(%arg0: i32) -> (i32, i32) {
    %c0_i32 = arith.constant 0 : i32
    %c0_i32_0 = arith.constant 0 : i32
    %c0_i32_1 = arith.constant 0 : i32
    return %c0_i32, %c0_i32_0 : i32, i32
  }
  func.func @transform_5(%arg0: i32) -> (i32, i32) {
    %c0_i32 = arith.constant 0 : i32
    %c0_i32_0 = arith.constant 0 : i32
    return %arg0, %c0_i32 : i32, i32
  }
}

</mosaic_0001>

<bundles_post_ra>
// kernel: tpu_custom_call.1
= control target key start
LH: loop header
LB: loop body
LE: loop exit
PB: predicated region body
PF: predicated region fallthrough
CT: control target
= control target key end

     0   :  { %10 = vsyncpa [#allocation3], 0  ;;  %s954_s0 = inlined_call_operand.hbm [shape: f32[16,256], index: 0, kind: input, shape index: {}]   ;;  %s955_s1 = inlined_call_operand.hbm [shape: f32[128,128], index: 1, kind: input, shape index: {}]   ;;  %s956_s2 = inlined_call_operand.vmem [shape: f32[1,128], index: 2, kind: input, shape index: {}]   ;;  %s957_s3 = inlined_call_operand.hbm [shape: f32[128,256], index: 3, kind: input, shape index: {}]   ;;  %s958_s4 = inlined_call_operand.vmem [shape: f32[1,256], index: 4, kind: input, shape index: {}]   ;;  %s959_s5 = inlined_call_operand.hbm [shape: f32[16,256], index: 5, kind: output, shape index: {}]  }
   0x1   :  { %12 = vsyncpa [#allocation3 + $0x1], 0 }
   0x2   :  { %13 = vsyncpa [#allocation6], 0 }
   0x3   :  { %14 = vsyncpa [#allocation4], 0 }
   0x4   :  { %16 = vsyncpa [#allocation4 + $0x1], 0  ;;  %s795_s18 = smov 0   ;;  %s797_s19 = smov 0  }
   0x5   :  { %s799_s20 = smov 0   ;;  %s801_s21 = smov 0  }
   0x6 LB: > { %s174_s24 = sshll.u32 %s955_s1, 4  ;;  %s819_s25 = sadd.s32 4294967295, %s757_s21   ;;  %s757_s21 = sphi %s801_s21, %s970_s21   ;;  %s753_s20 = sphi %s799_s20, %s969_s20   ;;  %s749_s19 = sphi %s797_s19, %s968_s19   ;;  %s745_s18 = sphi %s795_s18, %s967_s18   ;;  %s175_s24 = int_to_ptr.hbm [resolvable:$true] %s174_s24 }
   0x7   : > { %p506_p0 = scmp.ge.s32.totalorder %s757_s21, 1  ;;  %p43_p1 = scmp.eq.s32.totalorder %s819_s25, 0 }
   0x8   : > { %p163_p2 = scmp.lt.s32.totalorder %s757_s21, 3  ;;  %s759_s27 = smov [#allocation5]  }
   0x9   : > { %s176_s28 = sshll.u32 %s759_s27, 4  ;;  %s191_s6 = sshll.u32 %s957_s3, 4  ;;  %s177_s28 = int_to_ptr.vmem [resolvable:$true] %s176_s28  ;;  %s192_s6 = int_to_ptr.hbm [resolvable:$true] %s191_s6 }
   0xa   : > { %p824_p3 = pnand %p506_p0, %p163_p2  ;;  %s760_s7 = smov [#allocation7]  }
   0xb   : > { %s193_s8 = sshll.u32 %s760_s7, 4  ;;  %s761_s9 = smov 128   ;;  %s194_s8 = int_to_ptr.vmem [resolvable:$true] %s193_s8 }
   0xc   : > { %p537_p4 = pneg %p824_p3  ;;  %s762_s10 = smov 8  }
   0xd   : > { %s763_s11 = smov 256   ;;  %s764_s12 = smov 16  }
   0xe   : > { %p538_p6 = pnand %p537_p4, %p43_p1  ;;  %s505_s13 = sadd.s32 4294967294, %s757_s21  }
   0xf   : > { %s838_s14 = sadd.s32 1, %s757_s21   ;;  %s29_s16 = sadd.s32 1, %s753_s20 }
  0x10   : > { %540 = dma.hbm_to_vmem [thread:$0]  (!%p538_p6), %s175_s24, 2048, %s177_s28, [#allocation6], %s761_s9, %s761_s9, %s762_s10  }
  0x11   : > { %543 = dma.hbm_to_vmem [thread:$0]  (!%p538_p6), %s192_s6, 4096, %s194_s8, [#allocation6], %s763_s11, %s763_s11, %s764_s12  }
  0x12   : > { %s26_s15 = ssub.s32 %s757_s21, %s838_s14  ;;  %p36_p8 = scmp.ne.s32.totalorder %s753_s20, %s749_s19 }
  0x13   : > { %p27_p7 = scmp.eq.s32.totalorder %s26_s15, 0  ;;  %p37_p9 = scmp.eq.s32.totalorder %s757_s21, 0 }
  0x14   : > { %p42_p10 = scmp.ne.s32.totalorder %s749_s19, %s745_s18  ;;  %p150_p13 = scmp.eq.s32.totalorder %s819_s25, 1 }
  0x15   : > { %s849_s17 = scalar_select %p27_p7, %s753_s20, %s29_s16  }
  0x16   : > { %p851_p11 = por %p37_p9, %p36_p8  ;;  %p857_p12 = por %p43_p1, %p42_p10 }
  0x17   : > { %p156_p0 = scmp.eq.s32.totalorder %s505_s13, 1  ;;  %p554_p2 = scmp.lt.s32.totalorder %s757_s21, 2 }
  0x18   : > { %s210_s24 = sand.u32 1, %s753_s20   ;;  %p864_p4 = por %p150_p13, %p36_p8 }
  0x19   : > { %p868_p6 = por %p156_p0, %p42_p10  ;;  %s510_s29 = sshll.u32 %s210_s24, 4 }
  0x1a   : > { %s523_s30 = sshll.u32 %s757_s21, 4  ;;  %s214_s9 = scalar_lea.vmem [#allocation2], %s510_s29 }
  0x1b   : > { %s219_s8 = scalar_lea.hbm %s954_s0, %s523_s30  ;;  %s223_s10 = sshll.u32 %s214_s9, 4  ;;  %s224_s10 = int_to_ptr.vmem [resolvable:$true] %s223_s10 }
  0x1c   : > { %s221_s11 = sshll.u32 %s219_s8, 4  ;;  %p878_p7 = pnand %p554_p2, %p851_p11  ;;  %s222_s11 = int_to_ptr.hbm [resolvable:$true] %s221_s11 }
  0x1d   : > { %s211_s13 = scalar_lea.sflag [#allocation3], %s210_s24  ;;  %s657_s15 = sshra.s32 %s222_s11, 4  ;;  %s658_s15 = int_to_ptr.hbm [resolvable:$true] %s657_s15 }
  0x1e   : > { %s659_s16 = scalar_lea.hbm %s658_s15, 16  ;;  %p661_p9 = pneg %p878_p7 }
  0x1f   : > { %p660_p8 = scmp.ne.s32.totalorder %s658_s15, %s659_s16  ;;  %s664_s6 = scalar_lea.hbm %s954_s0, 32 }
  0x20   : > { %p665_p11 = scmp.lt.s32.totalorder %s658_s15, %s954_s0  ;;  %p666_p0 = scmp.lt.s32.totalorder %s664_s6, %s659_s16 }
  0x21   : > { %p662_p10 = pnand %p661_p9, %p660_p8 }
  0x22   : > { %p667_p2 = por %p666_p0, %p665_p11 }
  0x23   : > { %p663_p13 = pneg %p662_p10 }
  0x25   : > { %p668_p5 = pnand %p667_p2, %p663_p13 }
  0x27   : > { %671 = shalt.err (!%p668_p5)
}
  0x28   : > { %547 = dma.hbm_to_vmem [thread:$0]  (!%p878_p7), %s222_s11, 256, %s224_s10, %s211_s13  }
  0x29   : > { %232 = sbr.rel (%p824_p3) target bundleno = 348 (0x15c), region = 40  ;;  %s895_s24 = sand.u32 (!%p824_p3), 1, %s749_s19  }
  0x2a   : > { %s514_s8 = sshll.u32 (!%p824_p3), %s895_s24, 4  ;;  %s235_s9 = scalar_lea.sflag (!%p824_p3), [#allocation3], %s895_s24 }
  0x2b   : > { %s901_s15 = scalar_lea.vmem (!%p824_p3), [#allocation2], %s514_s8 }
  0x2e   : > { %732 = dma.done.wait (%p857_p12), %s235_s9, 256  }
  0x2f   : > { %734 = vsyncadd (%p857_p12), %s235_s9, 4294967040 }
  0x30   : > { %736 = dma.done.wait (%p43_p1), [#allocation6], 6144  }
  0x31   : > { %738 = vsyncadd (%p43_p1), [#allocation6], 4294961152  ;;  %v293_v0 = vld [vmem:[#allocation5 + $0x78] sm:$0xff]  ;;  %v292_v1 = vld [vmem:[#allocation5 + $0x70] sm:$0xff]  ;;  %s524_s12 = sshll.u32 %s819_s25, 4  ;;  %s275_s30 = scalar_lea.vmem [#allocation8], %s514_s8 }
  0x32   : > { %298 = vmatpush.msra.mxu0 %v293_v0  ;;  %v291_v2 = vld [vmem:[#allocation5 + $0x68] sm:$0xff]  ;;  %v290_v3 = vld [vmem:[#allocation5 + $0x60] sm:$0xff]  ;;  %v289_v4 = vld [vmem:[#allocation5 + $0x58] sm:$0xff]  ;;  %s411_s29 = scalar_lea.hbm %s959_s5, %s524_s12  ;;  %s413_s6 = sshll.u32 %s275_s30, 4  ;;  %s414_s6 = int_to_ptr.vmem [resolvable:$true] %s413_s6 }
  0x33   : > { %v349_v5 = vld [vmem:[#allocation7 + $0xf0] sm:$0xff]  ;;  %v350_v6 = vld [vmem:[#allocation7 + $0xf8] sm:$0xff]  ;;  %v347_v7 = vld [vmem:[#allocation7 + $0xe0] sm:$0xff]  ;;  %s415_s7 = sshll.u32 %s411_s29, 4  ;;  %s400_s22 = scalar_lea.sflag [#allocation4], %s895_s24  ;;  %s416_s7 = int_to_ptr.hbm [resolvable:$true] %s415_s7 }
  0x34   : > { %299 = vmatpush.msra.mxu0 %v292_v1  ;;  %357 = vmatpush.msra.mxu1 %v349_v5  ;;  %v348_v8 = vld [vmem:[#allocation7 + $0xe8] sm:$0xff]  ;;  %v345_v9 = vld [vmem:[#allocation7 + $0xd0] sm:$0xff]  ;;  %v346_v11 = vld [vmem:[#allocation7 + $0xd8] sm:$0xff]  ;;  %s701_s25 = sshra.s32 %s416_s7, 4  ;;  %s707_s8 = scalar_lea.hbm %s959_s5, 32  ;;  %s702_s25 = int_to_ptr.hbm [resolvable:$true] %s701_s25 }
  0x35   : > { %377 = vmatpush.msra.mxu2 %v350_v6  ;;  %v288_v10 = vld [vmem:[#allocation5 + $0x50] sm:$0xff]  ;;  %v343_v12 = vld [vmem:[#allocation7 + $0xc0] sm:$0xff]  ;;  %v287_v13 = vld [vmem:[#allocation5 + $0x48] sm:$0xff]  ;;  %s703_s9 = scalar_lea.hbm %s702_s25, 16  ;;  %p708_p12 = scmp.lt.s32.totalorder %s702_s25, %s959_s5 }
  0x36   : > { %300 = vmatpush.msra.mxu0 %v291_v2  ;;  %358 = vmatpush.msra.mxu1 %v347_v7  ;;  %v344_v14 = vld [vmem:[#allocation7 + $0xc8] sm:$0xff]  ;;  %v341_v15 = vld [vmem:[#allocation7 + $0xb0] sm:$0xff]  ;;  %v286_v16 = vld [vmem:[#allocation5 + $0x40] sm:$0xff]  ;;  %p704_p1 = scmp.ne.s32.totalorder %s702_s25, %s703_s9  ;;  %p709_p7 = scmp.lt.s32.totalorder %s707_s8, %s703_s9 }
  0x37   : > { %378 = vmatpush.msra.mxu2 %v348_v8  ;;  %v342_v17 = vld [vmem:[#allocation7 + $0xb8] sm:$0xff]  ;;  %v339_v18 = vld [vmem:[#allocation7 + $0xa0] sm:$0xff]  ;;  %v340_v20 = vld [vmem:[#allocation7 + $0xa8] sm:$0xff] }
  0x38   : > { %301 = vmatpush.msra.mxu0 %v290_v3  ;;  %359 = vmatpush.msra.mxu1 %v345_v9  ;;  %v285_v19 = vld [vmem:[#allocation5 + $0x38] sm:$0xff]  ;;  %v337_v21 = vld [vmem:[#allocation7 + $0x90] sm:$0xff]  ;;  %v335_v24 = vld [vmem:[#allocation7 + $0x80] sm:$0xff]  ;;  %p705_p3 = pnand %p704_p1, %p864_p4  ;;  %p710_p8 = por %p709_p7, %p708_p12 }
  0x39   : > { %379 = vmatpush.msra.mxu2 %v346_v11  ;;  %v284_v22 = vld [vmem:[#allocation5 + $0x30] sm:$0xff]  ;;  %v338_v23 = vld [vmem:[#allocation7 + $0x98] sm:$0xff]  ;;  %v283_v25 = vld [vmem:[#allocation5 + $0x28] sm:$0xff] }
  0x3a   : > { %302 = vmatpush.msra.mxu0 %v289_v4  ;;  %360 = vmatpush.msra.mxu1 %v343_v12  ;;  %v336_v26 = vld [vmem:[#allocation7 + $0x88] sm:$0xff]  ;;  %v333_v27 = vld [vmem:[#allocation7 + $0x70] sm:$0xff]  ;;  %v282_v28 = vld [vmem:[#allocation5 + $0x20] sm:$0xff]  ;;  %p706_p5 = pneg %p705_p3 }
  0x3b   : > { %380 = vmatpush.msra.mxu2 %v344_v14  ;;  %v334_v29 = vld [vmem:[#allocation7 + $0x78] sm:$0xff]  ;;  %v331_v30 = vld [vmem:[#allocation7 + $0x60] sm:$0xff]  ;;  %v332_v32 = vld [vmem:[#allocation7 + $0x68] sm:$0xff] }
  0x3c   : > { %303 = vmatpush.msra.mxu0 %v288_v10  ;;  %361 = vmatpush.msra.mxu1 %v341_v15  ;;  %v281_v31 = vld [vmem:[#allocation5 + $0x18] sm:$0xff]  ;;  %v329_v33 = vld [vmem:[#allocation7 + $0x50] sm:$0xff]  ;;  %v327_v36 = vld [vmem:[#allocation7 + $0x40] sm:$0xff]  ;;  %p711_p9 = pnand %p710_p8, %p706_p5 }
  0x3d   : > { %381 = vmatpush.msra.mxu2 %v342_v17  ;;  %v280_v34 = vld [vmem:[#allocation5 + $0x10] sm:$0xff]  ;;  %v330_v35 = vld [vmem:[#allocation7 + $0x58] sm:$0xff]  ;;  %v279_v37 = vld [vmem:[#allocation5 + $0x8] sm:$0xff] }
  0x3e   : > { %304 = vmatpush.msra.mxu0 %v287_v13  ;;  %362 = vmatpush.msra.mxu1 %v339_v18  ;;  %v328_v38 = vld [vmem:[#allocation7 + $0x48] sm:$0xff]  ;;  %v325_v39 = vld [vmem:[#allocation7 + $0x30] sm:$0xff]  ;;  %v278_v40 = vld [vmem:[#allocation5] sm:$0xff] }
  0x3f   : > { %382 = vmatpush.msra.mxu2 %v340_v20  ;;  %v326_v41 = vld [vmem:[#allocation7 + $0x38] sm:$0xff]  ;;  %v323_v43 = vld [vmem:[#allocation7 + $0x20] sm:$0xff]  ;;  %v324_v44 = vld [vmem:[#allocation7 + $0x28] sm:$0xff] }
  0x40   : > { %305 = vmatpush.msra.mxu0 %v286_v16  ;;  %363 = vmatpush.msra.mxu1 %v337_v21  ;;  %v277_v42 = vld [vmem:[%s901_s15 + $0x8] sm:$0xff]  ;;  %v321_v45 = vld [vmem:[#allocation7 + $0x10] sm:$0xff]  ;;  %v319_v47 = vld [vmem:[#allocation7] sm:$0xff] }
  0x41   : > { %383 = vmatpush.msra.mxu2 %v338_v23  ;;  %v322_v46 = vld [vmem:[#allocation7 + $0x18] sm:$0xff]  ;;  %v320_v48 = vld [vmem:[#allocation7 + $0x8] sm:$0xff]  ;;  %v596_v49 = vld [vmem:[%s956_s2] ss:$0 sm:$0xff] }
  0x42   : > { %306 = vmatpush.msra.mxu0 %v285_v19  ;;  %364 = vmatpush.msra.mxu1 %v335_v24  ;;  %v276_v51 = vld [vmem:[%s901_s15] sm:$0xff] }
  0x43   : > { %384 = vmatpush.msra.mxu2 %v336_v26  ;;  %v351_v54 = vld [vmem:[%s958_s4] sm:$0x3] }
  0x44   : > { %307 = vmatpush.msra.mxu0 %v284_v22  ;;  %365 = vmatpush.msra.mxu1 %v333_v27  ;;  %v353_v55 = vperm.slane %v351_v54, 0  ;;  %v354_v58 = vperm.slane %v351_v54, 1 }
  0x45   : > { %385 = vmatpush.msra.mxu2 %v334_v29 }
  0x46   : > { %308 = vmatpush.msra.mxu0 %v283_v25  ;;  %366 = vmatpush.msra.mxu1 %v331_v30 }
  0x47   : > { %386 = vmatpush.msra.mxu2 %v332_v32 }
  0x48   : > { %309 = vmatpush.msra.mxu0 %v282_v28  ;;  %367 = vmatpush.msra.mxu1 %v329_v33 }
  0x49   : > { %387 = vmatpush.msra.mxu2 %v330_v35 }
  0x4a   : > { %310 = vmatpush.msra.mxu0 %v281_v31  ;;  %368 = vmatpush.msra.mxu1 %v327_v36 }
  0x4b   : > { %388 = vmatpush.msra.mxu2 %v328_v38 }
  0x4c   : > { %311 = vmatpush.msra.mxu0 %v280_v34  ;;  %369 = vmatpush.msra.mxu1 %v325_v39 }
  0x4d   : > { %389 = vmatpush.msra.mxu2 %v326_v41 }
  0x4e   : > { %312 = vmatpush.msra.mxu0 %v279_v37  ;;  %370 = vmatpush.msra.mxu1 %v323_v43 }
  0x4f   : > { %390 = vmatpush.msra.mxu2 %v324_v44 }
  0x50   : > { %313 = vmatpush.msra.mxu0 %v278_v40  ;;  %371 = vmatpush.msra.mxu1 %v321_v45 }
  0x51   : > { %314 = vmatmul.f32.vlgmr.msra.gmra.mxu0 %v277_v42  ;;  %391 = vmatpush.msra.mxu2 %v322_v46 }
  0x52   : > { %372 = vmatpush.msra.mxu1 %v319_v47 }
  0x53   : > { %392 = vmatpush.msra.mxu2 %v320_v48 }
  0xce   : > { %v315_v50 = vpop.f32.mrf.mxu0 }
  0xcf   : > { %v316_v52 = vadd.f32 %v596_v49, %v315_v50 }
  0xd1   : > { %v318_v53 = vmul.f32 %v316_v52, %v276_v51 }
  0xd3   : > { %373 = vmatmul.f32.vlgmr.msra.gmra.mxu1 %v318_v53  ;;  %393 = vmatmul.f32.vlgmr.msra.gmra.mxu2 %v318_v53 }
 0x150   : > { %v374_v56 = vpop.f32.mrf.mxu1 }
 0x151   : > { %v375_v57 = vadd.f32 %v374_v56, %v353_v55 }
 0x153   : > { %397 = vst [vmem:[%s275_s30] sm:$0xff] %v375_v57 }
 0x156   : > { %v394_v59 = vpop.f32.mrf.mxu2 }
 0x157   : > { %v395_v60 = vadd.f32 %v394_v59, %v354_v58 }
 0x159   : > { %398 = vst [vmem:[%s275_s30 + $0x8] sm:$0xff] %v395_v60 }
 0x15a   : > { %714 = shalt.err (!%p711_p9)
}
 0x15b   : > { %535 = dma.vmem_to_hbm [thread:$0]  (%p864_p4), %s414_s6, 256, %s416_s7, %s400_s22  }
 0x15c PF: > { %s427_s24 = sand.u32 1, %s745_s18   ;;  %p966_p10 = scmp.ge.s32.totalorder %s757_s21, 2 }
 0x15d   : > { %s428_s11 = scalar_lea.sflag [#allocation4], %s427_s24 }
 0x15e   : > { %p549_p13 = pnand %p966_p10, %p868_p6 }
 0x160   : > { %p550_p11 = pneg %p549_p13 }
 0x162   : > { %740 = dma.done.wait (%p550_p11), %s428_s11, 256  }
 0x163   : > { %742 = vsyncadd (%p550_p11), %s428_s11, 4294967040  ;;  %p19_p0 = scmp.ge.s32.totalorder %s838_s14, 4   ;;  %s967_s18 = smov %s749_s19 }
 0x164   : > { %s968_s19 = smov %s753_s20  ;;  %s969_s20 = smov %s849_s17 }
 0x165   : > { %s970_s21 = smov %s838_s14  ;;  %21 = sbr.rel (!%p19_p0) target bundleno = 6 (0x6), region = 93 }
 0x16a   :  { %434 = vsyncpa [#allocation3], 1 }
 0x16b   :  { %436 = vsyncpa [#allocation3 + $0x1], 1 }
 0x16c   :  { %437 = vsyncpa [#allocation6], 1 }
 0x16d   :  { %438 = vsyncpa [#allocation4], 1 }
 0x16e   :  { %440 = vsyncpa [#allocation4 + $0x1], 1 }

</bundles_post_ra>
